<compile_context>
chip_gen: v6e
topology: v6e:2x2x1
jax: 0.10.0
libtpu: 0.0.40
codegen_flags: <defaults>
</compile_context>

<pallas_src>
import functools

import jax
import jax.numpy as jnp
from jax.experimental import pallas as pl
from jax.experimental.pallas import tpu as pltpu


def _second_orthogonal_loss_kernel(fake_ref, short_ref, long_ref, ratio_ref,
                                   *, batch, tb):
    i = pl.program_id(0)

    fake = fake_ref[...].astype(jnp.float32)            # (TB, D)
    short = short_ref[...].astype(jnp.float32)          # (TB, D)
    long_ = long_ref[...].astype(jnp.float32)           # (TB, D)

    d_short = jnp.sum(jnp.abs(fake - short), axis=-1, keepdims=True)  # (TB, 1)
    d_long = jnp.sum(jnp.abs(fake - long_), axis=-1, keepdims=True)   # (TB, 1)

    # Divide on the EUP (reciprocal), VALU for the multiply.
    ratio = d_short * pl.reciprocal(d_long, approx=False)             # (TB, 1)

    # Zero out rows that only exist due to grid padding (B % TB != 0).
    row_ids = i * tb + jax.lax.broadcasted_iota(jnp.int32, (tb, 1), 0)
    ratio_ref[...] = jnp.where(row_ids < batch, ratio, 0.0)


def second_orthogonal_loss(fake, reals, *, tb=None):
    """fake: (B, D), reals: (B, 2, D) -> scalar float32 loss."""
    B, D = fake.shape
    assert reals.shape == (B, 2, D)

    # Two contiguous (B, D) streams (done once in XLA, outside the kernel).
    short = reals[:, 0, :]
    long_ = reals[:, 1, :]

    if tb is None:
        # Keep 3 double-buffered (TB, D) input streams under ~8 MiB so the
        # kernel fits every generation's default scoped VMEM (v5e's 16 MiB is
        # the smallest).  Cap at 512 rows; round down to a multiple of 8.
        itemsize = jnp.dtype(fake.dtype).itemsize
        budget = 8 * 1024 * 1024
        bytes_per_row = 6 * D * itemsize           # 3 streams x double buffer
        tb = max(8, min(512, budget // max(bytes_per_row, 1)))
        tb = (tb // 8) * 8
    if tb >= B:
        tb = B                                     # full-dim block is allowed
    num_tiles = pl.cdiv(B, tb)

    kernel = functools.partial(_second_orthogonal_loss_kernel, batch=B, tb=tb)

    ratios = pl.pallas_call(
        kernel,
        out_shape=jax.ShapeDtypeStruct((num_tiles * tb, 1), jnp.float32),
        grid=(num_tiles,),
        in_specs=[
            pl.BlockSpec((tb, D), lambda i: (i, 0)),
            pl.BlockSpec((tb, D), lambda i: (i, 0)),
            pl.BlockSpec((tb, D), lambda i: (i, 0)),
        ],
        out_specs=pl.BlockSpec((tb, 1), lambda i: (i, 0)),
        compiler_params=pltpu.CompilerParams(
            dimension_semantics=("parallel",)),
    )(fake, short, long_)

    # Padded rows were zeroed in-kernel, so a plain sum / B is the exact mean.
    return jnp.sum(ratios) / B


def _reference(fake, reals):
    d_short = jnp.abs(fake - reals[:, 0, :]).sum(axis=-1)
    d_long = jnp.abs(fake - reals[:, 1, :]).sum(axis=-1)
    return jnp.mean(d_short / d_long)


if __name__ == "__main__":
    key = jax.random.PRNGKey(0)
    k_fake, k_reals = jax.random.split(key)

    # Small test shape consistent with the module's forward.
    B, D = 8, 32
    fake = jax.random.normal(k_fake, (B, D), dtype=jnp.float32)
    reals = jax.random.normal(k_reals, (B, 2, D), dtype=jnp.float32)

    loss = second_orthogonal_loss(fake, reals)
    jax.block_until_ready(loss)
    ref = _reference(fake, reals)
    assert jnp.allclose(loss, ref, rtol=1e-5, atol=1e-5), (loss, ref)

    # Exercise the multi-tile + padded-tail path (B not a multiple of TB).
    B2, D2 = 20, 64
    k_fake2, k_reals2 = jax.random.split(jax.random.PRNGKey(1))
    fake2 = jax.random.normal(k_fake2, (B2, D2), dtype=jnp.float32)
    reals2 = jax.random.normal(k_reals2, (B2, 2, D2), dtype=jnp.float32)

    loss2 = second_orthogonal_loss(fake2, reals2, tb=8)
    jax.block_until_ready(loss2)
    ref2 = _reference(fake2, reals2)
    assert jnp.allclose(loss2, ref2, rtol=1e-5, atol=1e-5), (loss2, ref2)

    print("KERNEL_OK")
</pallas_src>

<mosaic_0001>
module attributes {stable_mosaic.version = 11 : i64} {
  func.func @_second_orthogonal_loss_kernel(%arg0: i32, %arg1: memref<8x32xf32, #tpu.memory_space<vmem>>, %arg2: memref<8x32xf32, #tpu.memory_space<vmem>>, %arg3: memref<8x32xf32, #tpu.memory_space<vmem>>, %arg4: memref<8x1xf32, #tpu.memory_space<vmem>>) attributes {dimension_semantics = [#tpu.dimension_semantics<parallel>], iteration_bounds = array<i64: 1>, scalar_prefetch = 0 : i64, scratch_operands = 0 : i64, tpu.core_type = #tpu.core_type<tc>, window_params = [{transform_indices = @transform_0, window_bounds = array<i64: 8, 32>}, {transform_indices = @transform_1, window_bounds = array<i64: 8, 32>}, {transform_indices = @transform_2, window_bounds = array<i64: 8, 32>}, {transform_indices = @transform_3, window_bounds = array<i64: 8, 1>}]} {
    %c0 = arith.constant 0 : index
    %c0_0 = arith.constant 0 : index
    %0 = vector.load %arg1[%c0, %c0_0] : memref<8x32xf32, #tpu.memory_space<vmem>>, vector<8x32xf32>
    %c0_1 = arith.constant 0 : index
    %c0_2 = arith.constant 0 : index
    %1 = vector.load %arg2[%c0_1, %c0_2] : memref<8x32xf32, #tpu.memory_space<vmem>>, vector<8x32xf32>
    %c0_3 = arith.constant 0 : index
    %c0_4 = arith.constant 0 : index
    %2 = vector.load %arg3[%c0_3, %c0_4] : memref<8x32xf32, #tpu.memory_space<vmem>>, vector<8x32xf32>
    %3 = arith.subf %0, %1 : vector<8x32xf32>
    %4 = math.absf %3 : vector<8x32xf32>
    %cst = arith.constant dense<0.000000e+00> : vector<8xf32>
    %5 = vector.multi_reduction <add>, %4, %cst [1] : vector<8x32xf32> to vector<8xf32>
    %6 = vector.shape_cast %5 : vector<8xf32> to vector<8x1xf32>
    %7 = arith.subf %0, %2 : vector<8x32xf32>
    %8 = math.absf %7 : vector<8x32xf32>
    %cst_5 = arith.constant dense<0.000000e+00> : vector<8xf32>
    %9 = vector.multi_reduction <add>, %8, %cst_5 [1] : vector<8x32xf32> to vector<8xf32>
    %10 = vector.shape_cast %9 : vector<8xf32> to vector<8x1xf32>
    %11 = tpu.reciprocal %10 : vector<8x1xf32> -> vector<8x1xf32>
    %12 = arith.mulf %6, %11 : vector<8x1xf32>
    %c8_i32 = arith.constant 8 : i32
    %13 = arith.muli %arg0, %c8_i32 : i32
    %14 = tpu.iota {dimensions = array<i32: 0>} : vector<8x1xi32>
    %15 = vector.broadcast %13 : i32 to vector<8x1xi32>
    %16 = arith.addi %15, %14 : vector<8x1xi32>
    %c8_i32_6 = arith.constant 8 : i32
    %17 = vector.broadcast %c8_i32_6 : i32 to vector<8x1xi32>
    %18 = arith.cmpi slt, %16, %17 : vector<8x1xi32>
    %cst_7 = arith.constant 0.000000e+00 : f32
    %19 = vector.broadcast %cst_7 : f32 to vector<8x1xf32>
    %20 = arith.select %18, %12, %19 : vector<8x1xi1>, vector<8x1xf32>
    %c0_8 = arith.constant 0 : index
    %c0_9 = arith.constant 0 : index
    %21 = vector.load %arg4[%c0_8, %c0_9] : memref<8x1xf32, #tpu.memory_space<vmem>>, vector<8x1xf32>
    tpu.vector_store %arg4[%c0_8, %c0_9], %20 {strides = array<i32>} : memref<8x1xf32, #tpu.memory_space<vmem>>, vector<8x1xf32>,
    return
  }
  func.func @transform_0(%arg0: i32) -> (i32, i32) {
    %c0_i32 = arith.constant 0 : i32
    %c0_i32_0 = arith.constant 0 : i32
    return %arg0, %c0_i32 : i32, i32
  }
  func.func @transform_1(%arg0: i32) -> (i32, i32) {
    %c0_i32 = arith.constant 0 : i32
    %c0_i32_0 = arith.constant 0 : i32
    return %arg0, %c0_i32 : i32, i32
  }
  func.func @transform_2(%arg0: i32) -> (i32, i32) {
    %c0_i32 = arith.constant 0 : i32
    %c0_i32_0 = arith.constant 0 : i32
    return %arg0, %c0_i32 : i32, i32
  }
  func.func @transform_3(%arg0: i32) -> (i32, i32) {
    %c0_i32 = arith.constant 0 : i32
    %c0_i32_0 = arith.constant 0 : i32
    return %arg0, %c0_i32 : i32, i32
  }
}

</mosaic_0001>

<bundles_post_ra>
// kernel: tpu_custom_call.1
= control target key start
LH: loop header
LB: loop body
LE: loop exit
PB: predicated region body
PF: predicated region fallthrough
CT: control target
= control target key end

     0   :  { %8 = vsyncpa [#allocation3], 0  ;;  %s184_s0 = inlined_call_operand.hbm [shape: f32[8,32], index: 0, kind: input, shape index: {}]   ;;  %s185_s1 = inlined_call_operand.hbm [shape: f32[8,32], index: 1, kind: input, shape index: {}]   ;;  %s186_s2 = inlined_call_operand.hbm [shape: f32[8,32], index: 2, kind: input, shape index: {}]   ;;  %s187_s3 = inlined_call_operand.vmem [shape: f32[8,1], index: 3, kind: output, shape index: {}]  }
   0x1   :  { %9 = vsyncpa [#allocation5], 0  ;;  %s149_s12 = smov [#allocation4]   ;;  %s150_s14 = smov [#allocation2]  }
   0x2   :  { %s26_s13 = sshll.u32 %s149_s12, 4  ;;  %s16_s15 = sshll.u32 %s150_s14, 4  ;;  %s27_s13 = int_to_ptr.vmem [resolvable:$true] %s26_s13  ;;  %s17_s15 = int_to_ptr.vmem [resolvable:$true] %s16_s15 }
   0x3   :  { %s93_s16 = scalar_lea.vmem %s27_s13, 128  ;;  %p98_p1 = scmp.lt.s32.totalorder %s27_s13, %s27_s13 }
   0x4   :  { %p94_p0 = scmp.ne.s32.totalorder %s27_s13, %s93_s16  ;;  %p99_p2 = scmp.lt.s32.totalorder %s93_s16, %s93_s16 }
   0x6   :  { %p100_p3 = por %p99_p2, %p98_p1 }
   0x8   :  { %p101_p4 = pnand %p100_p3, %p94_p0 }
   0xa   :  { %104 = shalt.err (!%p101_p4)
}
   0xb   :  { %29 = dma.hbm_to_vmem [thread:$0]  %s185_s1, 128, %s27_s13, [#allocation5]  }
   0xc   :  { %s113_s19 = scalar_lea.vmem %s17_s15, 128  ;;  %p118_p6 = scmp.lt.s32.totalorder %s17_s15, %s17_s15 }
   0xd   :  { %p114_p5 = scmp.ne.s32.totalorder %s17_s15, %s113_s19  ;;  %p119_p7 = scmp.lt.s32.totalorder %s113_s19, %s113_s19 }
   0xf   :  { %p120_p8 = por %p119_p7, %p118_p6 }
  0x11   :  { %p121_p9 = pnand %p120_p8, %p114_p5 }
  0x13   :  { %124 = shalt.err (!%p121_p9)
}
  0x14   :  { %19 = dma.hbm_to_vmem [thread:$0]  %s184_s0, 128, %s17_s15, [#allocation3]  }
  0x15   :  { %s151_s22 = smov [#allocation6]  }
  0x16   :  { %s36_s23 = sshll.u32 %s151_s22, 4  ;;  %s37_s23 = int_to_ptr.vmem [resolvable:$true] %s36_s23 }
  0x17   :  { %s133_s24 = scalar_lea.vmem %s37_s23, 128  ;;  %p138_p11 = scmp.lt.s32.totalorder %s37_s23, %s37_s23 }
  0x18   :  { %p134_p10 = scmp.ne.s32.totalorder %s37_s23, %s133_s24  ;;  %p139_p12 = scmp.lt.s32.totalorder %s133_s24, %s133_s24 }
  0x1a   :  { %p140_p13 = por %p139_p12, %p138_p11 }
  0x1c   :  { %p141_p0 = pnand %p140_p13, %p134_p10 }
  0x1e   :  { %144 = shalt.err (!%p141_p0)
}
  0x1f   :  { %39 = dma.hbm_to_vmem [thread:$0]  %s186_s2, 128, %s37_s23, [#allocation5]  }
  0x20   :  { %145 = dma.done.wait [#allocation3], 128  }
  0x21   :  { %146 = vsyncadd [#allocation3], 4294967168 }
  0x22   :  { %147 = dma.done.wait [#allocation5], 256  }
  0x23   :  { %148 = vsyncadd [#allocation5], 4294967040  ;;  %v49_v0 = vld [vmem:[#allocation2] sm:$0xff]  ;;  %v51_v1 = vld [vmem:[#allocation6] sm:$0xff]  ;;  %vm54_vm0 = vcmask 261120   ;;  %vm72_vm1 = vcmask 7168  }
  0x24   :  { %v50_v2 = vld [vmem:[#allocation4] sm:$0xff]  ;;  %v58_v3 = vsub.f32 %v49_v0, %v51_v1 }
  0x25   :  { %v52_v4 = vsub.f32 %v49_v0, %v50_v2 }
  0x26   :  { %v59_v5 = vand.u32 2147483647, %v58_v3 }
  0x27   :  { %v53_v6 = vand.u32 2147483647, %v52_v4 }
  0x28   :  { %v60_v7 = vsel %vm54_vm0, %v59_v5, 0.0 }
  0x29   :  { %61 = vadd.xlane.f32.xlu0 %v60_v7  ;;  %v55_v8 = vsel %vm54_vm0, %v53_v6, 0.0 }
  0x2d   :  { %56 = vadd.xlane.f32.xlu0 %v55_v8 }
  0xb2   :  { %v62_v9 = vpop.xlane.xlu0 %61 }
  0xb3   :  { %83 = vrcp.f32 %v62_v9 }
  0xb6   :  { %v57_v10 = vpop.xlane.xlu0 %56 }
  0xc0   :  { %v84_v11 = vpop.eup %83 }
  0xc1   :  { %v64_v12 = vmul.f32 %v84_v11, %v57_v10 }
  0xc3   :  { %73 = vst.msk [vmem:[%s187_s3] sm:$0xff] %vm72_vm1, %v64_v12 }
  0xc4   :  { %78 = vsyncpa [#allocation3], 1 }
  0xc5   :  { %79 = vsyncpa [#allocation5], 1 }

</bundles_post_ra>
